<compile_context>
chip_gen: v6e
topology: v6e:2x2x1
jax: 0.10.0
libtpu: 0.0.40
codegen_flags: <defaults>
</compile_context>

<pallas_src>
import functools

import jax
import jax.numpy as jnp
from jax import lax
from jax.experimental import pallas as pl
from jax.experimental.pallas import tpu as pltpu


def _round_up(x, m):
    return ((x + m - 1) // m) * m


def _vmem_capacity_bytes():
    """Physical VMEM of the local TPU generation (conservative fallback)."""
    try:
        return int(pltpu.get_tpu_info().vmem_capacity_bytes)
    except Exception:
        return 64 * 1024 * 1024  # v7x-sized fallback: safe everywhere


def _resident_spec(shape_unused=None):
    """Spec for operands whose value is identical for every grid step.

    Whole-array, unpipelined VMEM placement => exactly one resident copy
    (no double-buffering), which is what pl.Buffered(1) would request for a
    constant-index BlockSpec, but via the long-established memory_space path.
    """
    return pl.BlockSpec(memory_space=pltpu.MemorySpace.VMEM)


def _choose_batch_tile(B, d_in, nh_p, d_out_p, resident_bytes, vmem_budget):
    """Rows per grid step.

    * multiple of 8 sublanes; multiple of 256 when B is large (fills the
      256-wide MXU rows on v6e/v7x and amortizes per-step overhead),
    * >= 2 tiles when B permits so the "parallel" batch axis can split
      across v7x's two TensorCores,
    * bounded so activations + double-buffered x/out tiles fit VMEM.
    """
    # f32 bytes per batch row: double-buffered x & out tiles + activation
    # headroom (a few live (row, nh_p) f32 values across the two streams).
    per_row = 4 * (2 * d_in + 2 * d_out_p + 4 * nh_p)
    avail = max(vmem_budget - resident_bytes, 4 << 20)
    vmem_rows = max(8, ((avail // per_row) // 8) * 8)

    if B <= 256:
        tb = _round_up(B, 16) if B >= 16 else 8
    else:
        tb = min(_round_up(pl.cdiv(B, 2), 256), 2048)
    return int(max(8, min(tb, vmem_rows)))


def _mlp_tanh_kernel(x_ref, w_in_ref, b_in_ref, w_hid_ref, b_hid_ref,
                     w_out_ref, b_out_ref, o_ref, *, n_layers, n_streams):
    """Fused MLP forward for one batch tile; all layers chained in VMEM.

    Shapes (nh/d_out lane-padded; d_in natural width):
      x tile : (TB, d_in)
      w_in   : (d_in, nh_p)        b_in  : (1, nh_p)      [f32]
      w_hid  : (L, nh_p, nh_p)     b_hid : (L, 1, nh_p)   [f32]
      w_out  : (nh_p, d_out_p)     b_out : (1, d_out_p)   [f32]
      out    : (TB, d_out_p)

    Weights may be bf16 (MXU-native); every dot accumulates in f32 and the
    bias add + tanh stay in f32.  The tile is split into `n_streams`
    independent row groups so the scheduler can overlap one group's MXU
    matmul with the other group's EUP tanh (different VLIW slots).
    """
    wd = w_in_ref.dtype
    rows = x_ref.shape[0] // n_streams

    def lin_tanh(h, w, b):
        return jnp.tanh(
            jnp.dot(h.astype(wd), w, preferred_element_type=jnp.float32) + b)

    # input layer
    hs = [lin_tanh(x_ref[s * rows:(s + 1) * rows, :],
                   w_in_ref[...], b_in_ref[...])
          for s in range(n_streams)]

    # hidden layers
    if n_layers <= 8:
        # short fixed trip count: static unroll (full schedule visible)
        for i in range(n_layers):
            hs = [lin_tanh(h, w_hid_ref[i], b_hid_ref[i]) for h in hs]
    else:
        def body(i, carry):
            return tuple(lin_tanh(h, w_hid_ref[i], b_hid_ref[i])
                         for h in carry)
        hs = list(lax.fori_loop(0, n_layers, body, tuple(hs)))

    # output layer (tanh applied here too, per the reference forward)
    for s in range(n_streams):
        out = lin_tanh(hs[s], w_out_ref[...], b_out_ref[...])
        o_ref[s * rows:(s + 1) * rows, :] = out.astype(o_ref.dtype)


def prepare_params(params, *, lane=128, weight_dtype=jnp.bfloat16):
    """One-time parameter prep (hoisted out of the per-call forward).

    Lane-pads nh / d_out to multiples of 128 with zeros (semantics preserved)
    and casts weights to `weight_dtype` (bf16 is MXU-native on v6e/v7x and
    halves resident VMEM / DMA).  Biases stay f32 (VPU/EUP work is f32).
    The input feature dim d_in is NOT padded: x is read at natural width and
    the MXU handles small K fine.
    """
    w_in, b_in, w_hid, b_hid, w_out, b_out = params
    nh = w_in.shape[1]
    d_out = w_out.shape[1]
    nh_p = _round_up(nh, lane)
    d_out_p = _round_up(d_out, lane)
    f32 = jnp.float32
    wd = weight_dtype
    return (
        jnp.pad(w_in.astype(f32), ((0, 0), (0, nh_p - nh))).astype(wd),
        jnp.pad(b_in.astype(f32), ((0, 0), (0, nh_p - nh))),
        jnp.pad(w_hid.astype(f32),
                ((0, 0), (0, nh_p - nh), (0, nh_p - nh))).astype(wd),
        jnp.pad(b_hid.astype(f32), ((0, 0), (0, 0), (0, nh_p - nh))),
        jnp.pad(w_out.astype(f32),
                ((0, nh_p - nh), (0, d_out_p - d_out))).astype(wd),
        jnp.pad(b_out.astype(f32), ((0, 0), (0, d_out_p - d_out))),
    )


def scaling_forward(x, padded_params, *, n_layers, d_out, max_batch_tile=2048):
    """Forward pass: one fused pallas_call over batch tiles.

    `padded_params` must come from `prepare_params` (padding / dtype prep is
    done once there, not per call).
    """
    w_in_p, b_in_p, w_hid_p, b_hid_p, w_out_p, b_out_p = padded_params
    B, d_in = x.shape
    assert w_in_p.shape[0] == d_in, "x feature dim does not match w_in"
    nh_p = w_in_p.shape[1]
    d_out_p = w_out_p.shape[1]
    L = w_hid_p.shape[0]

    resident_bytes = sum(int(a.size) * a.dtype.itemsize for a in padded_params)
    budget = int(_vmem_capacity_bytes() * 0.9)   # generation-aware cap

    TB = min(_choose_batch_tile(B, d_in, nh_p, d_out_p, resident_bytes, budget),
             max_batch_tile)
    TB = max(8, (TB // 8) * 8)
    n_tiles = pl.cdiv(B, TB)
    B_p = n_tiles * TB

    # Two independent row streams (>= 8 rows each) let the MXU matmul of one
    # stream hide the EUP tanh of the other.
    n_streams = 2 if (TB % 16 == 0 and TB >= 16) else 1

    xp = x.astype(jnp.float32)
    if B_p != B:                       # batch pad only when ragged (cheap)
        xp = jnp.pad(xp, ((0, B_p - B), (0, 0)))

    # VMEM accounting: single resident weight copy + double-buffered x/out
    # tiles + activation headroom.
    io_bytes = 2 * 4 * TB * (d_in + d_out_p)
    act_bytes = 4 * 4 * TB * nh_p
    needed = resident_bytes + io_bytes + act_bytes
    vmem_limit = int(min(max(needed + (8 << 20), 32 << 20), budget))

    flops = 2 * B_p * (d_in * nh_p + n_layers * nh_p * nh_p + nh_p * d_out_p)
    transcendentals = B_p * ((n_layers + 1) * nh_p + d_out_p)
    bytes_accessed = int(xp.size * 4 + resident_bytes + B_p * d_out_p * 4)

    kernel = functools.partial(_mlp_tanh_kernel, n_layers=n_layers,
                               n_streams=n_streams)

    out_p = pl.pallas_call(
        kernel,
        out_shape=jax.ShapeDtypeStruct((B_p, d_out_p), jnp.float32),
        grid_spec=pltpu.PrefetchScalarGridSpec(
            num_scalar_prefetch=0,
            grid=(n_tiles,),
            in_specs=[
                pl.BlockSpec((TB, d_in), lambda i: (i, 0)),   # x: batch-tiled
                _resident_spec(),                             # w_in  (VMEM, 1 copy)
                _resident_spec(),                             # b_in
                _resident_spec(),                             # w_hid
                _resident_spec(),                             # b_hid
                _resident_spec(),                             # w_out
                _resident_spec(),                             # b_out
            ],
            out_specs=pl.BlockSpec((TB, d_out_p), lambda i: (i, 0)),
        ),
        compiler_params=pltpu.CompilerParams(
            dimension_semantics=("parallel",),   # megacore split on v7x
            vmem_limit_bytes=vmem_limit,
        ),
        cost_estimate=pl.CostEstimate(
            flops=flops,
            transcendentals=transcendentals,
            bytes_accessed=bytes_accessed,
        ),
    )(xp, w_in_p, b_in_p, w_hid_p, b_hid_p, w_out_p, b_out_p)

    return out_p[:B, :d_out]


def init_params(key, d_in, nh, d_out, n_layers):
    """Deterministic synthetic parameters (PyTorch Linear-style uniform init).

    Biases stored 2-D/3-D with a size-1 sublane axis for clean (sublane, lane)
    layout inside the kernel.
    """
    ks = jax.random.split(key, 6)

    def uni(k, shape, fan_in):
        bound = 1.0 / jnp.sqrt(fan_in)
        return jax.random.uniform(k, shape, jnp.float32, -bound, bound)

    L = max(n_layers, 1)
    w_in = uni(ks[0], (d_in, nh), d_in)
    b_in = uni(ks[1], (1, nh), d_in)
    w_hid = uni(ks[2], (L, nh, nh), nh)
    b_hid = uni(ks[3], (L, 1, nh), nh)
    w_out = uni(ks[4], (nh, d_out), nh)
    b_out = uni(ks[5], (1, d_out), nh)
    return (w_in, b_in, w_hid, b_hid, w_out, b_out)


def reference_forward(x, params, n_layers):
    """Pure-JAX reference mirroring the PyTorch forward."""
    w_in, b_in, w_hid, b_hid, w_out, b_out = params
    h = jnp.tanh(x @ w_in + b_in)
    for i in range(n_layers):
        h = jnp.tanh(h @ w_hid[i] + b_hid[i])
    return jnp.tanh(h @ w_out + b_out)


if __name__ == "__main__":
    # Small shapes consistent with the module's forward: x is (batch, d_in).
    B, d_in, nh, d_out, n_layers = 32, 16, 32, 8, 2

    key = jax.random.PRNGKey(0)
    k_x, k_p = jax.random.split(key)
    x = jax.random.normal(k_x, (B, d_in), jnp.float32)
    params = init_params(k_p, d_in, nh, d_out, n_layers)
    ref = reference_forward(x, params, n_layers)

    fwd = functools.partial(scaling_forward, n_layers=n_layers, d_out=d_out)

    # bf16 weights (MXU-native path): loose tolerance vs the f32 reference.
    prep_bf16 = prepare_params(params, weight_dtype=jnp.bfloat16)
    out_bf16 = jax.block_until_ready(jax.jit(fwd)(x, prep_bf16))
    assert out_bf16.shape == (B, d_out)
    assert jnp.allclose(out_bf16, ref, atol=2e-2, rtol=2e-2), "bf16 mismatch"

    # f32 weights: tight tolerance vs the pure-JAX reference.
    prep_f32 = prepare_params(params, weight_dtype=jnp.float32)
    out_f32 = jax.block_until_ready(jax.jit(fwd)(x, prep_f32))
    assert out_f32.shape == (B, d_out)
    assert jnp.allclose(out_f32, ref, atol=1e-5, rtol=1e-5), "f32 mismatch"

    print("KERNEL_OK")
</pallas_src>

<mosaic_0001>
module attributes {stable_mosaic.version = 11 : i64} {
  func.func @_mlp_tanh_kernel(%arg0: i32, %arg1: memref<32x16xf32, #tpu.memory_space<vmem>>, %arg2: memref<16x128xbf16, #tpu.memory_space<vmem>>, %arg3: memref<1x128xf32, #tpu.memory_space<vmem>>, %arg4: memref<2x128x128xbf16, #tpu.memory_space<vmem>>, %arg5: memref<2x1x128xf32, #tpu.memory_space<vmem>>, %arg6: memref<128x128xbf16, #tpu.memory_space<vmem>>, %arg7: memref<1x128xf32, #tpu.memory_space<vmem>>, %arg8: memref<32x128xf32, #tpu.memory_space<vmem>>) attributes {dimension_semantics = [#tpu.dimension_semantics<parallel>], iteration_bounds = array<i64: 1>, scalar_prefetch = 0 : i64, scratch_operands = 0 : i64, tpu.core_type = #tpu.core_type<tc>, window_params = [{transform_indices = @transform_0, window_bounds = array<i64: 32, 16>}, {pipeline_mode = #tpu.pipeline_mode<synchronous>, transform_indices = @transform_1, window_bounds = array<i64: 16, 128>}, {pipeline_mode = #tpu.pipeline_mode<synchronous>, transform_indices = @transform_2, window_bounds = array<i64: 1, 128>}, {pipeline_mode = #tpu.pipeline_mode<synchronous>, transform_indices = @transform_3, window_bounds = array<i64: 2, 128, 128>}, {pipeline_mode = #tpu.pipeline_mode<synchronous>, transform_indices = @transform_4, window_bounds = array<i64: 2, 1, 128>}, {pipeline_mode = #tpu.pipeline_mode<synchronous>, transform_indices = @transform_5, window_bounds = array<i64: 128, 128>}, {pipeline_mode = #tpu.pipeline_mode<synchronous>, transform_indices = @transform_6, window_bounds = array<i64: 1, 128>}, {transform_indices = @transform_7, window_bounds = array<i64: 32, 128>}]} {
    %c0 = arith.constant 0 : index
    %c0_0 = arith.constant 0 : index
    %0 = vector.load %arg1[%c0, %c0_0] : memref<32x16xf32, #tpu.memory_space<vmem>>, vector<16x16xf32>
    %c0_1 = arith.constant 0 : index
    %c0_2 = arith.constant 0 : index
    %1 = vector.load %arg2[%c0_1, %c0_2] : memref<16x128xbf16, #tpu.memory_space<vmem>>, vector<16x128xbf16>
    %c0_3 = arith.constant 0 : index
    %c0_4 = arith.constant 0 : index
    %2 = vector.load %arg3[%c0_3, %c0_4] : memref<1x128xf32, #tpu.memory_space<vmem>>, vector<1x128xf32>
    %3 = arith.truncf %0 : vector<16x16xf32> to vector<16x16xbf16>
    %cst = arith.constant dense<0.000000e+00> : vector<16x128xf32>
    %4 = tpu.matmul %3, %1, %cst {dimension_numbers = #tpu.dot_dimension_numbers<[1], [0], [0], [1], [0, 0, 1, 1], [], []>} : vector<16x16xbf16>, vector<16x128xbf16>, vector<16x128xf32> -> vector<16x128xf32>
    %5 = vector.broadcast %2 : vector<1x128xf32> to vector<16x128xf32>
    %6 = arith.addf %4, %5 : vector<16x128xf32>
    %7 = math.tanh %6 : vector<16x128xf32>
    %c16 = arith.constant 16 : index
    %c0_5 = arith.constant 0 : index
    %8 = vector.load %arg1[%c16, %c0_5] : memref<32x16xf32, #tpu.memory_space<vmem>>, vector<16x16xf32>
    %c0_6 = arith.constant 0 : index
    %c0_7 = arith.constant 0 : index
    %9 = vector.load %arg2[%c0_6, %c0_7] : memref<16x128xbf16, #tpu.memory_space<vmem>>, vector<16x128xbf16>
    %c0_8 = arith.constant 0 : index
    %c0_9 = arith.constant 0 : index
    %10 = vector.load %arg3[%c0_8, %c0_9] : memref<1x128xf32, #tpu.memory_space<vmem>>, vector<1x128xf32>
    %11 = arith.truncf %8 : vector<16x16xf32> to vector<16x16xbf16>
    %cst_10 = arith.constant dense<0.000000e+00> : vector<16x128xf32>
    %12 = tpu.matmul %11, %9, %cst_10 {dimension_numbers = #tpu.dot_dimension_numbers<[1], [0], [0], [1], [0, 0, 1, 1], [], []>} : vector<16x16xbf16>, vector<16x128xbf16>, vector<16x128xf32> -> vector<16x128xf32>
    %13 = vector.broadcast %10 : vector<1x128xf32> to vector<16x128xf32>
    %14 = arith.addf %12, %13 : vector<16x128xf32>
    %15 = math.tanh %14 : vector<16x128xf32>
    %c0_11 = arith.constant 0 : index
    %c0_12 = arith.constant 0 : index
    %c0_13 = arith.constant 0 : index
    %16 = vector.load %arg4[%c0_11, %c0_12, %c0_13] : memref<2x128x128xbf16, #tpu.memory_space<vmem>>, vector<1x128x128xbf16>
    %17 = vector.shape_cast %16 : vector<1x128x128xbf16> to vector<128x128xbf16>
    %c0_14 = arith.constant 0 : index
    %c0_15 = arith.constant 0 : index
    %c0_16 = arith.constant 0 : index
    %18 = vector.load %arg5[%c0_14, %c0_15, %c0_16] : memref<2x1x128xf32, #tpu.memory_space<vmem>>, vector<1x1x128xf32>
    %19 = vector.shape_cast %18 : vector<1x1x128xf32> to vector<1x128xf32>
    %20 = arith.truncf %7 : vector<16x128xf32> to vector<16x128xbf16>
    %cst_17 = arith.constant dense<0.000000e+00> : vector<16x128xf32>
    %21 = tpu.matmul %20, %17, %cst_17 {dimension_numbers = #tpu.dot_dimension_numbers<[1], [0], [0], [1], [0, 0, 1, 1], [], []>} : vector<16x128xbf16>, vector<128x128xbf16>, vector<16x128xf32> -> vector<16x128xf32>
    %22 = vector.broadcast %19 : vector<1x128xf32> to vector<16x128xf32>
    %23 = arith.addf %21, %22 : vector<16x128xf32>
    %24 = math.tanh %23 : vector<16x128xf32>
    %c0_18 = arith.constant 0 : index
    %c0_19 = arith.constant 0 : index
    %c0_20 = arith.constant 0 : index
    %25 = vector.load %arg4[%c0_18, %c0_19, %c0_20] : memref<2x128x128xbf16, #tpu.memory_space<vmem>>, vector<1x128x128xbf16>
    %26 = vector.shape_cast %25 : vector<1x128x128xbf16> to vector<128x128xbf16>
    %c0_21 = arith.constant 0 : index
    %c0_22 = arith.constant 0 : index
    %c0_23 = arith.constant 0 : index
    %27 = vector.load %arg5[%c0_21, %c0_22, %c0_23] : memref<2x1x128xf32, #tpu.memory_space<vmem>>, vector<1x1x128xf32>
    %28 = vector.shape_cast %27 : vector<1x1x128xf32> to vector<1x128xf32>
    %29 = arith.truncf %15 : vector<16x128xf32> to vector<16x128xbf16>
    %cst_24 = arith.constant dense<0.000000e+00> : vector<16x128xf32>
    %30 = tpu.matmul %29, %26, %cst_24 {dimension_numbers = #tpu.dot_dimension_numbers<[1], [0], [0], [1], [0, 0, 1, 1], [], []>} : vector<16x128xbf16>, vector<128x128xbf16>, vector<16x128xf32> -> vector<16x128xf32>
    %31 = vector.broadcast %28 : vector<1x128xf32> to vector<16x128xf32>
    %32 = arith.addf %30, %31 : vector<16x128xf32>
    %33 = math.tanh %32 : vector<16x128xf32>
    %c1 = arith.constant 1 : index
    %c0_25 = arith.constant 0 : index
    %c0_26 = arith.constant 0 : index
    %34 = vector.load %arg4[%c1, %c0_25, %c0_26] : memref<2x128x128xbf16, #tpu.memory_space<vmem>>, vector<1x128x128xbf16>
    %35 = vector.shape_cast %34 : vector<1x128x128xbf16> to vector<128x128xbf16>
    %c1_27 = arith.constant 1 : index
    %c0_28 = arith.constant 0 : index
    %c0_29 = arith.constant 0 : index
    %36 = vector.load %arg5[%c1_27, %c0_28, %c0_29] : memref<2x1x128xf32, #tpu.memory_space<vmem>>, vector<1x1x128xf32>
    %37 = vector.shape_cast %36 : vector<1x1x128xf32> to vector<1x128xf32>
    %38 = arith.truncf %24 : vector<16x128xf32> to vector<16x128xbf16>
    %cst_30 = arith.constant dense<0.000000e+00> : vector<16x128xf32>
    %39 = tpu.matmul %38, %35, %cst_30 {dimension_numbers = #tpu.dot_dimension_numbers<[1], [0], [0], [1], [0, 0, 1, 1], [], []>} : vector<16x128xbf16>, vector<128x128xbf16>, vector<16x128xf32> -> vector<16x128xf32>
    %40 = vector.broadcast %37 : vector<1x128xf32> to vector<16x128xf32>
    %41 = arith.addf %39, %40 : vector<16x128xf32>
    %42 = math.tanh %41 : vector<16x128xf32>
    %c1_31 = arith.constant 1 : index
    %c0_32 = arith.constant 0 : index
    %c0_33 = arith.constant 0 : index
    %43 = vector.load %arg4[%c1_31, %c0_32, %c0_33] : memref<2x128x128xbf16, #tpu.memory_space<vmem>>, vector<1x128x128xbf16>
    %44 = vector.shape_cast %43 : vector<1x128x128xbf16> to vector<128x128xbf16>
    %c1_34 = arith.constant 1 : index
    %c0_35 = arith.constant 0 : index
    %c0_36 = arith.constant 0 : index
    %45 = vector.load %arg5[%c1_34, %c0_35, %c0_36] : memref<2x1x128xf32, #tpu.memory_space<vmem>>, vector<1x1x128xf32>
    %46 = vector.shape_cast %45 : vector<1x1x128xf32> to vector<1x128xf32>
    %47 = arith.truncf %33 : vector<16x128xf32> to vector<16x128xbf16>
    %cst_37 = arith.constant dense<0.000000e+00> : vector<16x128xf32>
    %48 = tpu.matmul %47, %44, %cst_37 {dimension_numbers = #tpu.dot_dimension_numbers<[1], [0], [0], [1], [0, 0, 1, 1], [], []>} : vector<16x128xbf16>, vector<128x128xbf16>, vector<16x128xf32> -> vector<16x128xf32>
    %49 = vector.broadcast %46 : vector<1x128xf32> to vector<16x128xf32>
    %50 = arith.addf %48, %49 : vector<16x128xf32>
    %51 = math.tanh %50 : vector<16x128xf32>
    %c0_38 = arith.constant 0 : index
    %c0_39 = arith.constant 0 : index
    %52 = vector.load %arg6[%c0_38, %c0_39] : memref<128x128xbf16, #tpu.memory_space<vmem>>, vector<128x128xbf16>
    %c0_40 = arith.constant 0 : index
    %c0_41 = arith.constant 0 : index
    %53 = vector.load %arg7[%c0_40, %c0_41] : memref<1x128xf32, #tpu.memory_space<vmem>>, vector<1x128xf32>
    %54 = arith.truncf %42 : vector<16x128xf32> to vector<16x128xbf16>
    %cst_42 = arith.constant dense<0.000000e+00> : vector<16x128xf32>
    %55 = tpu.matmul %54, %52, %cst_42 {dimension_numbers = #tpu.dot_dimension_numbers<[1], [0], [0], [1], [0, 0, 1, 1], [], []>} : vector<16x128xbf16>, vector<128x128xbf16>, vector<16x128xf32> -> vector<16x128xf32>
    %56 = vector.broadcast %53 : vector<1x128xf32> to vector<16x128xf32>
    %57 = arith.addf %55, %56 : vector<16x128xf32>
    %58 = math.tanh %57 : vector<16x128xf32>
    %c0_43 = arith.constant 0 : index
    %c0_44 = arith.constant 0 : index
    %59 = vector.load %arg8[%c0_43, %c0_44] : memref<32x128xf32, #tpu.memory_space<vmem>>, vector<16x128xf32>
    tpu.vector_store %arg8[%c0_43, %c0_44], %58 {strides = array<i32>} : memref<32x128xf32, #tpu.memory_space<vmem>>, vector<16x128xf32>,
    %c0_45 = arith.constant 0 : index
    %c0_46 = arith.constant 0 : index
    %60 = vector.load %arg6[%c0_45, %c0_46] : memref<128x128xbf16, #tpu.memory_space<vmem>>, vector<128x128xbf16>
    %c0_47 = arith.constant 0 : index
    %c0_48 = arith.constant 0 : index
    %61 = vector.load %arg7[%c0_47, %c0_48] : memref<1x128xf32, #tpu.memory_space<vmem>>, vector<1x128xf32>
    %62 = arith.truncf %51 : vector<16x128xf32> to vector<16x128xbf16>
    %cst_49 = arith.constant dense<0.000000e+00> : vector<16x128xf32>
    %63 = tpu.matmul %62, %60, %cst_49 {dimension_numbers = #tpu.dot_dimension_numbers<[1], [0], [0], [1], [0, 0, 1, 1], [], []>} : vector<16x128xbf16>, vector<128x128xbf16>, vector<16x128xf32> -> vector<16x128xf32>
    %64 = vector.broadcast %61 : vector<1x128xf32> to vector<16x128xf32>
    %65 = arith.addf %63, %64 : vector<16x128xf32>
    %66 = math.tanh %65 : vector<16x128xf32>
    %c16_50 = arith.constant 16 : index
    %c0_51 = arith.constant 0 : index
    %67 = vector.load %arg8[%c16_50, %c0_51] : memref<32x128xf32, #tpu.memory_space<vmem>>, vector<16x128xf32>
    tpu.vector_store %arg8[%c16_50, %c0_51], %66 {strides = array<i32>} : memref<32x128xf32, #tpu.memory_space<vmem>>, vector<16x128xf32>,
    return
  }
  func.func @transform_0(%arg0: i32) -> (i32, i32) {
    %c0_i32 = arith.constant 0 : i32
    %c0_i32_0 = arith.constant 0 : i32
    return %arg0, %c0_i32 : i32, i32
  }
  func.func @transform_1(%arg0: i32) -> (i32, i32) {
    %c0_i32 = arith.constant 0 : i32
    %c0_i32_0 = arith.constant 0 : i32
    %c0_i32_1 = arith.constant 0 : i32
    return %c0_i32, %c0_i32_0 : i32, i32
  }
  func.func @transform_2(%arg0: i32) -> (i32, i32) {
    %c0_i32 = arith.constant 0 : i32
    %c0_i32_0 = arith.constant 0 : i32
    %c0_i32_1 = arith.constant 0 : i32
    return %c0_i32, %c0_i32_0 : i32, i32
  }
  func.func @transform_3(%arg0: i32) -> (i32, i32, i32) {
    %c0_i32 = arith.constant 0 : i32
    %c0_i32_0 = arith.constant 0 : i32
    %c0_i32_1 = arith.constant 0 : i32
    %c0_i32_2 = arith.constant 0 : i32
    return %c0_i32, %c0_i32_0, %c0_i32_1 : i32, i32, i32
  }
  func.func @transform_4(%arg0: i32) -> (i32, i32, i32) {
    %c0_i32 = arith.constant 0 : i32
    %c0_i32_0 = arith.constant 0 : i32
    %c0_i32_1 = arith.constant 0 : i32
    %c0_i32_2 = arith.constant 0 : i32
    return %c0_i32, %c0_i32_0, %c0_i32_1 : i32, i32, i32
  }
  func.func @transform_5(%arg0: i32) -> (i32, i32) {
    %c0_i32 = arith.constant 0 : i32
    %c0_i32_0 = arith.constant 0 : i32
    %c0_i32_1 = arith.constant 0 : i32
    return %c0_i32, %c0_i32_0 : i32, i32
  }
  func.func @transform_6(%arg0: i32) -> (i32, i32) {
    %c0_i32 = arith.constant 0 : i32
    %c0_i32_0 = arith.constant 0 : i32
    %c0_i32_1 = arith.constant 0 : i32
    return %c0_i32, %c0_i32_0 : i32, i32
  }
  func.func @transform_7(%arg0: i32) -> (i32, i32) {
    %c0_i32 = arith.constant 0 : i32
    %c0_i32_0 = arith.constant 0 : i32
    return %arg0, %c0_i32 : i32, i32
  }
}

</mosaic_0001>

<bundles_post_ra>
// kernel: scaling_forward.1
= control target key start
LH: loop header
LB: loop body
LE: loop exit
PB: predicated region body
PF: predicated region fallthrough
CT: control target
= control target key end

     0   :  { %12 = vsyncpa [#allocation3], 0  ;;  %s1232_s0 = inlined_call_operand.vmem [shape: f32[32,16], index: 0, kind: input, shape index: {}]   ;;  %s1233_s1 = inlined_call_operand.vmem [shape: bf16[16,128], index: 1, kind: input, shape index: {}]   ;;  %s1234_s2 = inlined_call_operand.vmem [shape: f32[1,128], index: 2, kind: input, shape index: {}]   ;;  %s1235_s3 = inlined_call_operand.hbm [shape: bf16[2,128,128], index: 3, kind: input, shape index: {}]   ;;  %s1236_s4 = inlined_call_operand.vmem [shape: f32[2,1,128], index: 4, kind: input, shape index: {}]   ;;  %s1237_s5 = inlined_call_operand.hbm [shape: bf16[128,128], index: 5, kind: input, shape index: {}]   ;;  %s1238_s6 = inlined_call_operand.vmem [shape: f32[1,128], index: 6, kind: input, shape index: {}]   ;;  %s1239_s7 = inlined_call_operand.vmem [shape: f32[32,128], index: 7, kind: output, shape index: {}]  }
   0x1   :  { %13 = vsyncpa [#allocation5], 0  ;;  %s1075_s24 = smov [#allocation2]  }
   0x2   :  { %s25_s25 = sshll.u32 %s1075_s24, 4  ;;  %s26_s25 = int_to_ptr.vmem [resolvable:$true] %s25_s25 }
   0x3   :  { %s1039_s26 = scalar_lea.vmem %s26_s25, 2048  ;;  %p1044_p1 = scmp.lt.s32.totalorder %s26_s25, %s26_s25 }
   0x4   :  { %p1040_p0 = scmp.ne.s32.totalorder %s26_s25, %s1039_s26  ;;  %p1045_p2 = scmp.lt.s32.totalorder %s1039_s26, %s1039_s26 }
   0x6   :  { %p1046_p3 = por %p1045_p2, %p1044_p1 }
   0x8   :  { %p1047_p4 = pnand %p1046_p3, %p1040_p0 }
   0xa   :  { %1050 = shalt.err (!%p1047_p4)
}
   0xb   :  { %s1076_s27 = smov 64   ;;  %s1077_s28 = smov 4  }
   0xc   :  { %31 = dma.hbm_to_vmem [thread:$0]  %s1235_s3, 2048, %s26_s25, [#allocation3], %s1076_s27, %s1076_s27, %s1077_s28  }
   0xd   :  { %s1078_s8 = smov [#allocation4]  }
   0xe   :  { %s39_s9 = sshll.u32 %s1078_s8, 4  ;;  %s40_s9 = int_to_ptr.vmem [resolvable:$true] %s39_s9 }
   0xf   :  { %s1059_s10 = scalar_lea.vmem %s40_s9, 1024  ;;  %p1064_p6 = scmp.lt.s32.totalorder %s40_s9, %s40_s9 }
  0x10   :  { %p1060_p5 = scmp.ne.s32.totalorder %s40_s9, %s1059_s10  ;;  %p1065_p7 = scmp.lt.s32.totalorder %s1059_s10, %s1059_s10 }
  0x12   :  { %p1066_p8 = por %p1065_p7, %p1064_p6 }
  0x14   :  { %p1067_p9 = pnand %p1066_p8, %p1060_p5 }
  0x16   :  { %1070 = shalt.err (!%p1067_p9)
}
  0x17   :  { %45 = dma.hbm_to_vmem [thread:$0]  %s1237_s5, 1024, %s40_s9, [#allocation5], %s1076_s27, %s1076_s27, %s1077_s28  }
  0x18   :  { %1071 = dma.done.wait [#allocation3], 2048  }
  0x19   :  { %1072 = vsyncadd [#allocation3], 4294965248 }
  0x1a   :  { %1073 = dma.done.wait [#allocation5], 1024  }
  0x1b   :  { %1074 = vsyncadd [#allocation5], 4294966272  ;;  %v1079_v0 = vmov 0.0   ;;  %vm1080_vm0 = vmmov 0   ;;  %v966_v1 = vld [vmem:[%s1233_s1] sm:$0xff]   ;;  %v56_v3 = vld [vmem:[%s1232_s0 + $0x8] sm:$0xff] }
  0x1c   :  { %828 = vmatprep.subr.bf16.mxu0 %v1079_v0  ;;  %834 = vmatprep.subr.bf16.mxu1 %v1079_v0  ;;  %v55_v2 = vld [vmem:[%s1232_s0] sm:$0xff]  ;;  %v120_v4 = vld [vmem:[%s1232_s0 + $0x10] sm:$0xff]  ;;  %vm73_vm1 = vcmask 130048   ;;  %v121_v6 = vld [vmem:[%s1232_s0 + $0x18] sm:$0xff] }
  0x1d   :  { %830 = vmatprep.mubr.msk.bf16.mxu0 %vm1080_vm0, %v1079_v0  ;;  %836 = vmatprep.mubr.msk.bf16.mxu1 %vm1080_vm0, %v1079_v0  ;;  %v60_v5 = vpack.c.bf16 %v56_v3, %v55_v2  ;;  %v122_v7 = vpack.c.bf16 %v121_v6, %v120_v4  ;;  %v967_v8 = vld [vmem:[#allocation2 + $0x38] sm:$0xff]   ;;  %v968_v9 = vld [vmem:[#allocation2 + $0x30] sm:$0xff]   ;;  %v969_v10 = vld [vmem:[#allocation2 + $0x28] sm:$0xff]  }
  0x1e   :  { %829 = vmatpush3.bf16.msra.mxu0 %v966_v1  ;;  %835 = vmatpush3.bf16.msra.mxu1 %v966_v1  ;;  %v970_v11 = vld [vmem:[#allocation2 + $0x20] sm:$0xff]   ;;  %v971_v12 = vld [vmem:[#allocation2 + $0x18] sm:$0xff]   ;;  %v972_v13 = vld [vmem:[#allocation2 + $0x10] sm:$0xff]  }
  0x1f   :  { %840 = vmatprep.subr.bf16.mxu0 %v1079_v0  ;;  %860 = vmatprep.subr.bf16.mxu1 %v1079_v0  ;;  %v973_v14 = vld [vmem:[#allocation2 + $0x8] sm:$0xff]   ;;  %v974_v15 = vld [vmem:[#allocation2] sm:$0xff]   ;;  %v975_v32 = vld [vmem:[#allocation2 + $0x78] sm:$0xff]  }
  0x20   :  { %v729_v16 = vld [vmem:[%s1234_s2] ss:$0 sm:$0xff]  ;;  %v976_v36 = vld [vmem:[#allocation2 + $0x70] sm:$0xff]   ;;  %v977_v37 = vld [vmem:[#allocation2 + $0x68] sm:$0xff]  }
  0x21   :  { %831 = vmatmul.mubr.msk.bf16.vlgmr.msra.gmra.mxu0 %vm73_vm1, %v60_v5  ;;  %837 = vmatmul.mubr.msk.bf16.vlgmr.msra.gmra.mxu1 %vm73_vm1, %v122_v7  ;;  %v978_v38 = vld [vmem:[#allocation2 + $0x60] sm:$0xff]   ;;  %v979_v39 = vld [vmem:[#allocation2 + $0x58] sm:$0xff]   ;;  %v980_v40 = vld [vmem:[#allocation2 + $0x50] sm:$0xff]  }
  0x22   :  { %841 = vmatpush3.bf16.msra.mxu0 %v967_v8  ;;  %861 = vmatpush3.bf16.msra.mxu1 %v967_v8  ;;  %v981_v41 = vld [vmem:[#allocation2 + $0x48] sm:$0xff]   ;;  %v982_v42 = vld [vmem:[#allocation2 + $0x40] sm:$0xff]   ;;  %v983_v59 = vld [vmem:[#allocation4 + $0x38] sm:$0xff]  }
  0x23   :  { %842 = vmatprep.subr.bf16.mxu0 %v1079_v0  ;;  %862 = vmatprep.subr.bf16.mxu1 %v1079_v0  ;;  %v733_v43 = vld [vmem:[%s1236_s4] ss:$0 sm:$0xff]  ;;  %v984_v62 = vld [vmem:[#allocation4 + $0x38] sm:$0xff]   ;;  %v985_v1 = vld [vmem:[#allocation4 + $0x30] sm:$0xff]  }
  0x24   :  { %856 = vmatprep.mubr.msk.bf16.mxu0 %vm1080_vm0, %v1079_v0  ;;  %876 = vmatprep.mubr.msk.bf16.mxu1 %vm1080_vm0, %v1079_v0  ;;  %v986_v2 = vld [vmem:[#allocation4 + $0x30] sm:$0xff]   ;;  %v987_v3 = vld [vmem:[#allocation4 + $0x28] sm:$0xff]   ;;  %v989_v5 = vld [vmem:[#allocation4 + $0x20] sm:$0xff]  }
  0x25   :  { %v988_v4 = vld [vmem:[#allocation4 + $0x28] sm:$0xff]   ;;  %v990_v6 = vld [vmem:[#allocation4 + $0x20] sm:$0xff]   ;;  %v991_v7 = vld [vmem:[#allocation4 + $0x18] sm:$0xff]  }
  0x26   :  { %843 = vmatpush3.bf16.msra.mxu0 %v968_v9  ;;  %863 = vmatpush3.bf16.msra.mxu1 %v968_v9  ;;  %v992_v8 = vld [vmem:[#allocation4 + $0x18] sm:$0xff]   ;;  %v993_v9 = vld [vmem:[#allocation4 + $0x10] sm:$0xff]  }
  0x27   :  { %844 = vmatprep.subr.bf16.mxu0 %v1079_v0  ;;  %864 = vmatprep.subr.bf16.mxu1 %v1079_v0 }
  0x2a   :  { %845 = vmatpush3.bf16.msra.mxu0 %v969_v10  ;;  %865 = vmatpush3.bf16.msra.mxu1 %v969_v10  ;;  %v994_v10 = vld [vmem:[#allocation4 + $0x10] sm:$0xff]  }
  0x2b   :  { %846 = vmatprep.subr.bf16.mxu0 %v1079_v0  ;;  %866 = vmatprep.subr.bf16.mxu1 %v1079_v0 }
  0x2e   :  { %847 = vmatpush3.bf16.msra.mxu0 %v970_v11  ;;  %867 = vmatpush3.bf16.msra.mxu1 %v970_v11  ;;  %v995_v11 = vld [vmem:[#allocation4 + $0x8] sm:$0xff]  }
  0x2f   :  { %848 = vmatprep.subr.bf16.mxu0 %v1079_v0  ;;  %868 = vmatprep.subr.bf16.mxu1 %v1079_v0 }
  0x32   :  { %849 = vmatpush3.bf16.msra.mxu0 %v971_v12  ;;  %869 = vmatpush3.bf16.msra.mxu1 %v971_v12  ;;  %v996_v12 = vld [vmem:[#allocation4 + $0x8] sm:$0xff]  }
  0x33   :  { %850 = vmatprep.subr.bf16.mxu0 %v1079_v0  ;;  %870 = vmatprep.subr.bf16.mxu1 %v1079_v0 }
  0x36   :  { %851 = vmatpush3.bf16.msra.mxu0 %v972_v13  ;;  %871 = vmatpush3.bf16.msra.mxu1 %v972_v13  ;;  %v997_v13 = vld [vmem:[#allocation4] sm:$0xff]  }
  0x37   :  { %852 = vmatprep.subr.bf16.mxu0 %v1079_v0  ;;  %872 = vmatprep.subr.bf16.mxu1 %v1079_v0 }
  0x3a   :  { %853 = vmatpush3.bf16.msra.mxu0 %v973_v14  ;;  %873 = vmatpush3.bf16.msra.mxu1 %v973_v14  ;;  %v998_v14 = vld [vmem:[#allocation4] sm:$0xff]  }
  0x3b   :  { %854 = vmatprep.subr.bf16.mxu0 %v1079_v0  ;;  %874 = vmatprep.subr.bf16.mxu1 %v1079_v0 }
  0x3e   :  { %855 = vmatpush3.bf16.msra.mxu0 %v974_v15  ;;  %875 = vmatpush3.bf16.msra.mxu1 %v974_v15  ;;  %v743_v15 = vld [vmem:[%s1236_s4 + $0x1] ss:$0 sm:$0xff] }
  0x3f   :  { %880 = vmatprep.subr.bf16.mxu0 %v1079_v0  ;;  %900 = vmatprep.subr.bf16.mxu1 %v1079_v0 }
  0xe1   :  { %v111_v17 = vpop.f32.mrf.mxu0  ;;  %v160_v18 = vpop.f32.mrf.mxu1 }
  0xe2   :  { %v112_v19 = vadd.f32 %v729_v16, %v111_v17  ;;  %v161_v20 = vadd.f32 %v729_v16, %v160_v18 }
  0xe3   :  { %v832_v21 = vpop.f32.mrf.mxu0  ;;  %v838_v22 = vpop.f32.mrf.mxu1 }
  0xe4   :  { %999 = vtanh.f32 %v112_v19 }
  0xe5   :  { %v114_v23 = vpop.f32.mrf.mxu0  ;;  %v163_v24 = vpop.f32.mrf.mxu1  ;;  %1001 = vtanh.f32 %v161_v20 }
  0xe6   :  { %v115_v25 = vadd.f32 %v729_v16, %v114_v23  ;;  %v164_v26 = vadd.f32 %v729_v16, %v163_v24 }
  0xe7   :  { %v833_v27 = vpop.f32.mrf.mxu0  ;;  %v839_v28 = vpop.f32.mrf.mxu1 }
  0xe8   :  { %1003 = vtanh.f32 %v115_v25 }
  0xe9   :  { %1005 = vtanh.f32 %v164_v26 }
  0xf1   :  { %v1000_v29 = vpop.eup %999 }
  0xf2   :  { %v1002_v30 = vpop.eup %1001 }
  0xf5   :  { %v1004_v31 = vpop.eup %1003 }
  0xf6   :  { %v1006_v33 = vpop.eup %1005  ;;  %v186_v34 = vpack.c.bf16 %v1004_v31, %v1000_v29 }
  0xf7   :  { %v284_v35 = vpack.c.bf16 %v1006_v33, %v1002_v30  ;;  %v752_v33 = vld [vmem:[%s1238_s6] ss:$0 sm:$0xff] }
  0xf8   :  { %857 = vmatmul.mubr.bf16.vlgmr.msra.gmra.mxu0 %v186_v34 }
  0xf9   :  { %877 = vmatmul.mubr.bf16.vlgmr.msra.gmra.mxu1 %v284_v35  ;;  %881 = vmatpush3.bf16.msra.mxu0 %v975_v32 }
  0xfa   :  { %901 = vmatpush3.bf16.msra.mxu1 %v975_v32  ;;  %882 = vmatprep.subr.bf16.mxu0 %v1079_v0 }
  0xfb   :  { %902 = vmatprep.subr.bf16.mxu1 %v1079_v0  ;;  %896 = vmatprep.mubr.msk.bf16.mxu0 %vm1080_vm0, %v1079_v0 }
  0xfc   :  { %916 = vmatprep.mubr.msk.bf16.mxu1 %vm1080_vm0, %v1079_v0 }
  0xfd   :  { %883 = vmatpush3.bf16.msra.mxu0 %v976_v36 }
  0xfe   :  { %903 = vmatpush3.bf16.msra.mxu1 %v976_v36  ;;  %884 = vmatprep.subr.bf16.mxu0 %v1079_v0 }
  0xff   :  { %904 = vmatprep.subr.bf16.mxu1 %v1079_v0 }
 0x101   :  { %885 = vmatpush3.bf16.msra.mxu0 %v977_v37 }
 0x102   :  { %905 = vmatpush3.bf16.msra.mxu1 %v977_v37  ;;  %886 = vmatprep.subr.bf16.mxu0 %v1079_v0 }
 0x103   :  { %906 = vmatprep.subr.bf16.mxu1 %v1079_v0 }
 0x105   :  { %887 = vmatpush3.bf16.msra.mxu0 %v978_v38 }
 0x106   :  { %907 = vmatpush3.bf16.msra.mxu1 %v978_v38  ;;  %888 = vmatprep.subr.bf16.mxu0 %v1079_v0 }
 0x107   :  { %908 = vmatprep.subr.bf16.mxu1 %v1079_v0 }
 0x109   :  { %889 = vmatpush3.bf16.msra.mxu0 %v979_v39 }
 0x10a   :  { %909 = vmatpush3.bf16.msra.mxu1 %v979_v39  ;;  %890 = vmatprep.subr.bf16.mxu0 %v1079_v0 }
 0x10b   :  { %910 = vmatprep.subr.bf16.mxu1 %v1079_v0 }
 0x10d   :  { %891 = vmatpush3.bf16.msra.mxu0 %v980_v40 }
 0x10e   :  { %911 = vmatpush3.bf16.msra.mxu1 %v980_v40  ;;  %892 = vmatprep.subr.bf16.mxu0 %v1079_v0 }
 0x10f   :  { %912 = vmatprep.subr.bf16.mxu1 %v1079_v0 }
 0x111   :  { %893 = vmatpush3.bf16.msra.mxu0 %v981_v41 }
 0x112   :  { %913 = vmatpush3.bf16.msra.mxu1 %v981_v41  ;;  %894 = vmatprep.subr.bf16.mxu0 %v1079_v0 }
 0x113   :  { %914 = vmatprep.subr.bf16.mxu1 %v1079_v0 }
 0x115   :  { %895 = vmatpush3.bf16.msra.mxu0 %v982_v42 }
 0x116   :  { %915 = vmatpush3.bf16.msra.mxu1 %v982_v42  ;;  %920 = vmatprep.subr.bf16.mxu0 %v1079_v0 }
 0x117   :  { %940 = vmatprep.subr.bf16.mxu1 %v1079_v0 }
 0x1b8   :  { %v275_v44 = vpop.f32.mrf.mxu0 }
 0x1b9   :  { %v276_v45 = vadd.f32 %v733_v43, %v275_v44  ;;  %v319_v46 = vpop.f32.mrf.mxu1 }
 0x1ba   :  { %v320_v47 = vadd.f32 %v733_v43, %v319_v46  ;;  %v858_v48 = vpop.f32.mrf.mxu0 }
 0x1bb   :  { %v878_v49 = vpop.f32.mrf.mxu1  ;;  %1007 = vtanh.f32 %v276_v45 }
 0x1bc   :  { %v278_v50 = vpop.f32.mrf.mxu0  ;;  %1009 = vtanh.f32 %v320_v47 }
 0x1bd   :  { %v279_v51 = vadd.f32 %v733_v43, %v278_v50  ;;  %v322_v52 = vpop.f32.mrf.mxu1 }
 0x1be   :  { %v323_v53 = vadd.f32 %v733_v43, %v322_v52  ;;  %v859_v54 = vpop.f32.mrf.mxu0 }
 0x1bf   :  { %1011 = vtanh.f32 %v279_v51  ;;  %v879_v55 = vpop.f32.mrf.mxu1 }
 0x1c0   :  { %1013 = vtanh.f32 %v323_v53 }
 0x1c8   :  { %v1008_v56 = vpop.eup %1007 }
 0x1c9   :  { %v1010_v57 = vpop.eup %1009 }
 0x1cc   :  { %v1012_v58 = vpop.eup %1011 }
 0x1cd   :  { %v1014_v60 = vpop.eup %1013  ;;  %v347_v61 = vpack.c.bf16 %v1012_v58, %v1008_v56 }
 0x1ce   :  { %v445_v63 = vpack.c.bf16 %v1014_v60, %v1010_v57 }
 0x1cf   :  { %897 = vmatmul.mubr.bf16.vlgmr.msra.gmra.mxu0 %v347_v61 }
 0x1d0   :  { %917 = vmatmul.mubr.bf16.vlgmr.msra.gmra.mxu1 %v445_v63  ;;  %921 = vmatpush3.bf16.msra.mxu0 %v983_v59 }
 0x1d1   :  { %941 = vmatpush3.bf16.msra.mxu1 %v984_v62  ;;  %922 = vmatprep.subr.bf16.mxu0 %v1079_v0 }
 0x1d2   :  { %942 = vmatprep.subr.bf16.mxu1 %v1079_v0  ;;  %936 = vmatprep.mubr.msk.bf16.mxu0 %vm1080_vm0, %v1079_v0 }
 0x1d3   :  { %956 = vmatprep.mubr.msk.bf16.mxu1 %vm1080_vm0, %v1079_v0 }
 0x1d4   :  { %923 = vmatpush3.bf16.msra.mxu0 %v985_v1 }
 0x1d5   :  { %943 = vmatpush3.bf16.msra.mxu1 %v986_v2  ;;  %924 = vmatprep.subr.bf16.mxu0 %v1079_v0 }
 0x1d6   :  { %944 = vmatprep.subr.bf16.mxu1 %v1079_v0 }
 0x1d8   :  { %925 = vmatpush3.bf16.msra.mxu0 %v987_v3 }
 0x1d9   :  { %945 = vmatpush3.bf16.msra.mxu1 %v988_v4  ;;  %926 = vmatprep.subr.bf16.mxu0 %v1079_v0 }
 0x1da   :  { %946 = vmatprep.subr.bf16.mxu1 %v1079_v0 }
 0x1dc   :  { %927 = vmatpush3.bf16.msra.mxu0 %v989_v5 }
 0x1dd   :  { %947 = vmatpush3.bf16.msra.mxu1 %v990_v6  ;;  %928 = vmatprep.subr.bf16.mxu0 %v1079_v0 }
 0x1de   :  { %948 = vmatprep.subr.bf16.mxu1 %v1079_v0 }
 0x1e0   :  { %929 = vmatpush3.bf16.msra.mxu0 %v991_v7 }
 0x1e1   :  { %949 = vmatpush3.bf16.msra.mxu1 %v992_v8  ;;  %930 = vmatprep.subr.bf16.mxu0 %v1079_v0 }
 0x1e2   :  { %950 = vmatprep.subr.bf16.mxu1 %v1079_v0 }
 0x1e4   :  { %931 = vmatpush3.bf16.msra.mxu0 %v993_v9 }
 0x1e5   :  { %951 = vmatpush3.bf16.msra.mxu1 %v994_v10  ;;  %932 = vmatprep.subr.bf16.mxu0 %v1079_v0 }
 0x1e6   :  { %952 = vmatprep.subr.bf16.mxu1 %v1079_v0 }
 0x1e8   :  { %933 = vmatpush3.bf16.msra.mxu0 %v995_v11 }
 0x1e9   :  { %953 = vmatpush3.bf16.msra.mxu1 %v996_v12  ;;  %934 = vmatprep.subr.bf16.mxu0 %v1079_v0 }
 0x1ea   :  { %954 = vmatprep.subr.bf16.mxu1 %v1079_v0 }
 0x1ec   :  { %935 = vmatpush3.bf16.msra.mxu0 %v997_v13 }
 0x1ed   :  { %955 = vmatpush3.bf16.msra.mxu1 %v998_v14 }
 0x28f   :  { %v436_v16 = vpop.f32.mrf.mxu0 }
 0x290   :  { %v437_v17 = vadd.f32 %v743_v15, %v436_v16  ;;  %v480_v18 = vpop.f32.mrf.mxu1 }
 0x291   :  { %v481_v19 = vadd.f32 %v743_v15, %v480_v18  ;;  %v898_v20 = vpop.f32.mrf.mxu0 }
 0x292   :  { %v918_v21 = vpop.f32.mrf.mxu1  ;;  %1015 = vtanh.f32 %v437_v17 }
 0x293   :  { %v439_v22 = vpop.f32.mrf.mxu0  ;;  %1017 = vtanh.f32 %v481_v19 }
 0x294   :  { %v440_v23 = vadd.f32 %v743_v15, %v439_v22  ;;  %v483_v24 = vpop.f32.mrf.mxu1 }
 0x295   :  { %v484_v25 = vadd.f32 %v743_v15, %v483_v24  ;;  %v899_v26 = vpop.f32.mrf.mxu0 }
 0x296   :  { %1019 = vtanh.f32 %v440_v23  ;;  %v919_v0 = vpop.f32.mrf.mxu1 }
 0x297   :  { %1021 = vtanh.f32 %v484_v25 }
 0x29f   :  { %v1016_v27 = vpop.eup %1015 }
 0x2a0   :  { %v1018_v28 = vpop.eup %1017 }
 0x2a3   :  { %v1020_v29 = vpop.eup %1019 }
 0x2a4   :  { %v1022_v30 = vpop.eup %1021  ;;  %v506_v31 = vpack.c.bf16 %v1020_v29, %v1016_v27 }
 0x2a5   :  { %v623_v32 = vpack.c.bf16 %v1022_v30, %v1018_v28 }
 0x2a6   :  { %937 = vmatmul.mubr.bf16.vlgmr.msra.gmra.mxu0 %v506_v31 }
 0x2a7   :  { %957 = vmatmul.mubr.bf16.vlgmr.msra.gmra.mxu1 %v623_v32 }
 0x366   :  { %v595_v34 = vpop.f32.mrf.mxu0 }
 0x367   :  { %v596_v35 = vadd.f32 %v752_v33, %v595_v34  ;;  %v712_v36 = vpop.f32.mrf.mxu1 }
 0x368   :  { %v713_v37 = vadd.f32 %v752_v33, %v712_v36  ;;  %v938_v38 = vpop.f32.mrf.mxu0 }
 0x369   :  { %1023 = vtanh.f32 %v596_v35  ;;  %v958_v39 = vpop.f32.mrf.mxu1 }
 0x36a   :  { %1025 = vtanh.f32 %v713_v37  ;;  %v598_v40 = vpop.f32.mrf.mxu0 }
 0x36b   :  { %v599_v41 = vadd.f32 %v752_v33, %v598_v40  ;;  %v715_v42 = vpop.f32.mrf.mxu1 }
 0x36c   :  { %v716_v43 = vadd.f32 %v752_v33, %v715_v42  ;;  %v939_v44 = vpop.f32.mrf.mxu0 }
 0x36d   :  { %1027 = vtanh.f32 %v599_v41  ;;  %v959_v45 = vpop.f32.mrf.mxu1 }
 0x36e   :  { %1029 = vtanh.f32 %v716_v43 }
 0x376   :  { %v1024_v46 = vpop.eup %1023 }
 0x377   :  { %v1026_v47 = vpop.eup %1025  ;;  %604 = vst [vmem:[%s1239_s7] sm:$0xff] %v1024_v46 }
 0x378   :  { %721 = vst [vmem:[%s1239_s7 + $0x10] sm:$0xff] %v1026_v47 }
 0x37a   :  { %v1028_v48 = vpop.eup %1027 }
 0x37b   :  { %v1030_v49 = vpop.eup %1029  ;;  %605 = vst [vmem:[%s1239_s7 + $0x8] sm:$0xff] %v1028_v48 }
 0x37c   :  { %722 = vst [vmem:[%s1239_s7 + $0x18] sm:$0xff] %v1030_v49 }
 0x37d   :  { %727 = vsyncpa [#allocation3], 1 }
 0x37e   :  { %728 = vsyncpa [#allocation5], 1 }

</bundles_post_ra>
